<compile_context>
chip_gen: v5e
topology: v5e:2x2
jax: 0.10.0
libtpu: 0.0.40
codegen_flags: <defaults>
</compile_context>

<pallas_src>
import functools
import math

import jax
import jax.numpy as jnp
from jax.experimental import pallas as pl
from jax.experimental.pallas import tpu as pltpu


# ----------------------------------------------------------------------------
# Helpers
# ----------------------------------------------------------------------------
def _round_up(n, m):
    return ((n + m - 1) // m) * m


def _num_tensorcores():
    """Best-effort TensorCore count per chip (v7x: 2, v5e/v6e: 1)."""
    try:
        info = pltpu.get_tpu_info()
        for name in ("num_tensorcores", "tensorcores_per_chip", "num_cores",
                     "core_count"):
            val = getattr(info, name, None)
            if isinstance(val, int) and val >= 1:
                return val
    except Exception:
        pass
    try:
        kind = jax.devices()[0].device_kind.lower()
        if "v7" in kind:
            return 2
    except Exception:
        pass
    return 1


def _choose_tiling(R, n_tc):
    """Return (tile_rows, grid, padded_rows).

    Single-TC (v5e/v6e): one big resident tile whenever the whole problem fits
    (per-step overhead ~0.35 us buys nothing without a second core).
    Multi-TC (v7x): 512-row tiles (multiple of 128 -> lane-dense transposed
    stores) and an even number of grid steps so both TCs get equal work.
    """
    R8 = _round_up(max(R, 1), 8)
    single_cap = 2048 if n_tc == 1 else 256
    if R8 <= single_cap:
        return R8, 1, R8
    tr = 1024 if n_tc == 1 else 512          # multiples of 128
    grid = (R + tr - 1) // tr                # pl.cdiv on python ints
    if n_tc > 1 and grid % n_tc:
        grid += n_tc - (grid % n_tc)         # balanced TC load on v7x
    return tr, grid, grid * tr


# ----------------------------------------------------------------------------
# Pallas kernel: fused (backbone patch-conv -> ReLU -> 1x1 input_proj -> T)
# ----------------------------------------------------------------------------
def encoder_kernel(x_ref, w1_ref, b1_ref, w2_ref, b2_ref, o_ref):
    x = x_ref[...]                                                # (TR, K1) bf16
    # GEMM 1 on the MXU (bf16 operands, f32 accumulation); epilogue on the VPU.
    h = jnp.dot(x, w1_ref[...], preferred_element_type=jnp.float32)      # (TR, N1p)
    h = jnp.maximum(h + b1_ref[...], 0.0)                         # bias + ReLU (f32)
    # GEMM 2; padded rows of w2 are zero so the N1 padding is inert.
    y = jnp.dot(h.astype(jnp.bfloat16), w2_ref[...],
                preferred_element_type=jnp.float32) + b2_ref[...]        # (TR, N2p)
    # Channel-major epilogue: the XLU transpose rides a different VLIW slot
    # than the MXU/VPU work; output leaves the kernel as lean bf16.
    o_ref[...] = jnp.transpose(y).astype(o_ref.dtype)             # (N2p, TR)


def encoder_matmul(patches, w1, b1, w2, b2, *, tile_rows, grid):
    R_pad, K1 = patches.shape
    N1p = w1.shape[1]
    N2p = w2.shape[1]

    cost = pl.CostEstimate(
        flops=2 * R_pad * (K1 * N1p + N1p * N2p),
        transcendentals=0,
        bytes_accessed=(R_pad * K1 * 2          # bf16 activations in
                        + N2p * R_pad * 2        # bf16 activations out
                        + K1 * N1p * 2 + N1p * N2p * 2   # bf16 weights
                        + (N1p + N2p) * 4),      # f32 biases
    )

    return pl.pallas_call(
        encoder_kernel,
        out_shape=jax.ShapeDtypeStruct((N2p, R_pad), jnp.bfloat16),
        grid=(grid,),
        in_specs=[
            pl.BlockSpec((tile_rows, K1), lambda i: (i, 0)),      # patch rows (tiled)
            # Weights/biases: constant index_maps -> resident across grid steps.
            pl.BlockSpec((K1, N1p), lambda i: (0, 0)),
            pl.BlockSpec((1, N1p), lambda i: (0, 0)),
            pl.BlockSpec((N1p, N2p), lambda i: (0, 0)),
            pl.BlockSpec((1, N2p), lambda i: (0, 0)),
        ],
        out_specs=pl.BlockSpec((N2p, tile_rows), lambda i: (0, i)),
        compiler_params=pltpu.CompilerParams(
            dimension_semantics=("parallel",),
            vmem_limit_bytes=32 * 1024 * 1024,
        ),
        cost_estimate=cost,
    )(patches, w1, b1, w2, b2)


# ----------------------------------------------------------------------------
# Sine positional embedding (shape-static table; plain jnp, no kernel launch)
# ----------------------------------------------------------------------------
def sine_pos_embedding(hidden_dim, hf, wf, temperature=10000.0):
    """DETR PositionEmbeddingSine(normalize=True) with an all-ones mask."""
    npf = hidden_dim // 2
    eps = 1e-6
    scale = 2.0 * math.pi
    y_embed = (jnp.arange(1, hf + 1, dtype=jnp.float32) / (hf + eps)) * scale
    x_embed = (jnp.arange(1, wf + 1, dtype=jnp.float32) / (wf + eps)) * scale
    dim_t = jnp.arange(npf, dtype=jnp.float32)
    dim_t = temperature ** (2.0 * jnp.floor(dim_t / 2.0) / npf)

    ang_y = jnp.broadcast_to(y_embed[None, :, None] / dim_t[:, None, None], (npf, hf, wf))
    ang_x = jnp.broadcast_to(x_embed[None, None, :] / dim_t[:, None, None], (npf, hf, wf))
    angles = jnp.concatenate([ang_y, ang_x], axis=0)              # (hidden, hf, wf)

    ch = jnp.arange(hidden_dim, dtype=jnp.int32)[:, None, None]
    is_sin = ((ch % npf) % 2) == 0                                # even sub-channel -> sin
    return jnp.where(is_sin, jnp.sin(angles), jnp.cos(angles))


# ----------------------------------------------------------------------------
# Forward wrapper (glue: reshapes / parameter layout / padding)
# ----------------------------------------------------------------------------
def image_encoder_forward(x, params, *, patch):
    """
    x: (B, V, 3, H, W)  ->  (img_feat, pos), both (B, hidden, Hf, V*Wf)
    (matches the PyTorch forward: per-view features concatenated along W.)
    """
    B, V, C, H, W = x.shape
    P = patch
    Hf, Wf = H // P, W // P

    w_bb, b_bb, w_pr, b_pr = (params["w_backbone"], params["b_backbone"],
                              params["w_proj"], params["b_proj"])
    num_channels = w_bb.shape[0]
    hidden = w_pr.shape[0]
    K1 = C * P * P                                                # NOT padded (contiguous DMA)
    N1p = _round_up(num_channels, 128)                            # lane-pad GEMM-1 N / GEMM-2 K
    N2p = _round_up(hidden, 128)                                  # lane-pad GEMM-2 N

    R = B * V * Hf * Wf
    tile_rows, grid, R_pad = _choose_tiling(R, _num_tensorcores())

    # bf16 BEFORE the patch reshape/transpose: halves that HBM round trip.
    xb = x.astype(jnp.bfloat16)
    patches = xb.reshape(B, V, C, Hf, P, Wf, P)
    patches = jnp.transpose(patches, (0, 1, 3, 5, 2, 4, 6))       # (B,V,Hf,Wf,C,P,P)
    patches = patches.reshape(R, K1)
    if R_pad != R:                                                # zero-pad to full tiles
        patches = jnp.pad(patches, ((0, R_pad - R), (0, 0)))

    # Torch conv weight layouts -> zero-padded GEMM layouts.
    w1 = w_bb.reshape(num_channels, K1).T                         # (K1, num_channels)
    w1 = jnp.pad(w1, ((0, 0), (0, N1p - num_channels))).astype(jnp.bfloat16)
    b1 = jnp.pad(b_bb, (0, N1p - num_channels)).reshape(1, N1p).astype(jnp.float32)
    w2 = w_pr.reshape(hidden, num_channels).T                     # (num_channels, hidden)
    w2 = jnp.pad(w2, ((0, N1p - num_channels), (0, N2p - hidden))).astype(jnp.bfloat16)
    b2 = jnp.pad(b_pr, (0, N2p - hidden)).reshape(1, N2p).astype(jnp.float32)

    yt = encoder_matmul(patches, w1, b1, w2, b2,
                        tile_rows=tile_rows, grid=grid)           # (N2p, R_pad) bf16
    y = yt[:hidden, :R]                                           # leading-dim strip (cheap)
    y = y.reshape(hidden, B, V, Hf, Wf)
    y = jnp.transpose(y, (1, 0, 3, 2, 4))                         # (B, hidden, Hf, V, Wf)
    img_feat = y.reshape(B, hidden, Hf, V * Wf).astype(jnp.float32)

    pos_view = sine_pos_embedding(hidden, Hf, Wf)                 # (hidden, Hf, Wf)
    pos = jnp.broadcast_to(pos_view[None, :, :, None, :], (B, hidden, Hf, V, Wf))
    pos = pos.reshape(B, hidden, Hf, V * Wf)
    return img_feat, pos


# ----------------------------------------------------------------------------
# Pure-f32 JAX reference (same synthetic backbone), for a tolerance check
# ----------------------------------------------------------------------------
def reference_forward_f32(x, params, patch):
    B, V, C, H, W = x.shape
    P = patch
    Hf, Wf = H // P, W // P
    w_bb, b_bb = params["w_backbone"], params["b_backbone"]
    w_pr, b_pr = params["w_proj"], params["b_proj"]
    nc, hidden = w_bb.shape[0], w_pr.shape[0]

    patches = x.reshape(B, V, C, Hf, P, Wf, P)
    patches = jnp.transpose(patches, (0, 1, 3, 5, 2, 4, 6)).reshape(B * V * Hf * Wf, -1)
    h = jnp.maximum(patches @ w_bb.reshape(nc, -1).T + b_bb, 0.0)
    y = h @ w_pr.reshape(hidden, nc).T + b_pr
    y = y.reshape(B, V, Hf, Wf, hidden)
    y = jnp.transpose(y, (0, 4, 2, 1, 3)).reshape(B, hidden, Hf, V * Wf)
    return y


# ----------------------------------------------------------------------------
# Main
# ----------------------------------------------------------------------------
if __name__ == "__main__":
    B, V, C, H, W = 2, 2, 3, 16, 16       # input_shape = (V, C, H, W)
    hidden_dim = 32
    num_channels = 64                     # synthetic backbone.num_channels
    P = 4                                 # synthetic backbone downsample factor

    key = jax.random.PRNGKey(0)
    kx, k1, k2, k3, k4 = jax.random.split(key, 5)

    x = jax.random.normal(kx, (B, V, C, H, W), dtype=jnp.float32)

    params = {
        "w_backbone": 0.05 * jax.random.normal(k1, (num_channels, C, P, P), jnp.float32),
        "b_backbone": 0.01 * jax.random.normal(k2, (num_channels,), jnp.float32),
        "w_proj": 0.05 * jax.random.normal(k3, (hidden_dim, num_channels, 1, 1), jnp.float32),
        "b_proj": 0.01 * jax.random.normal(k4, (hidden_dim,), jnp.float32),
    }

    fwd = jax.jit(functools.partial(image_encoder_forward, patch=P))
    img_feat, pos = fwd(x, params)
    jax.block_until_ready((img_feat, pos))

    Hf, Wf = H // P, W // P
    assert img_feat.shape == (B, hidden_dim, Hf, V * Wf), img_feat.shape
    assert pos.shape == (B, hidden_dim, Hf, V * Wf), pos.shape
    assert bool(jnp.all(jnp.isfinite(img_feat))) and bool(jnp.all(jnp.isfinite(pos)))

    # bf16 MXU path vs f32 reference: expect ~1e-3..1e-2 error on O(0.1) values.
    ref = reference_forward_f32(x, params, P)
    max_err = float(jnp.max(jnp.abs(img_feat - ref)))
    assert max_err < 2e-2, f"max abs err vs f32 reference: {max_err}"

    print("KERNEL_OK")
</pallas_src>

<mosaic_0001>
module attributes {stable_mosaic.version = 11 : i64} {
  func.func @encoder_kernel(%arg0: i32, %arg1: memref<64x48xbf16, #tpu.memory_space<vmem>>, %arg2: memref<48x128xbf16, #tpu.memory_space<vmem>>, %arg3: memref<1x128xf32, #tpu.memory_space<vmem>>, %arg4: memref<128x128xbf16, #tpu.memory_space<vmem>>, %arg5: memref<1x128xf32, #tpu.memory_space<vmem>>, %arg6: memref<128x64xbf16, #tpu.memory_space<vmem>>) attributes {dimension_semantics = [#tpu.dimension_semantics<parallel>], iteration_bounds = array<i64: 1>, scalar_prefetch = 0 : i64, scratch_operands = 0 : i64, tpu.core_type = #tpu.core_type<tc>, window_params = [{transform_indices = @transform_0, window_bounds = array<i64: 64, 48>}, {pipeline_mode = #tpu.pipeline_mode<synchronous>, transform_indices = @transform_1, window_bounds = array<i64: 48, 128>}, {pipeline_mode = #tpu.pipeline_mode<synchronous>, transform_indices = @transform_2, window_bounds = array<i64: 1, 128>}, {pipeline_mode = #tpu.pipeline_mode<synchronous>, transform_indices = @transform_3, window_bounds = array<i64: 128, 128>}, {pipeline_mode = #tpu.pipeline_mode<synchronous>, transform_indices = @transform_4, window_bounds = array<i64: 1, 128>}, {transform_indices = @transform_5, window_bounds = array<i64: 128, 64>}]} {
    %c0 = arith.constant 0 : index
    %c0_0 = arith.constant 0 : index
    %0 = vector.load %arg1[%c0, %c0_0] : memref<64x48xbf16, #tpu.memory_space<vmem>>, vector<64x48xbf16>
    %c0_1 = arith.constant 0 : index
    %c0_2 = arith.constant 0 : index
    %1 = vector.load %arg2[%c0_1, %c0_2] : memref<48x128xbf16, #tpu.memory_space<vmem>>, vector<48x128xbf16>
    %cst = arith.constant dense<0.000000e+00> : vector<64x128xf32>
    %2 = tpu.matmul %0, %1, %cst {dimension_numbers = #tpu.dot_dimension_numbers<[1], [0], [0], [1], [0, 0, 1, 1], [], []>} : vector<64x48xbf16>, vector<48x128xbf16>, vector<64x128xf32> -> vector<64x128xf32>
    %c0_3 = arith.constant 0 : index
    %c0_4 = arith.constant 0 : index
    %3 = vector.load %arg3[%c0_3, %c0_4] : memref<1x128xf32, #tpu.memory_space<vmem>>, vector<1x128xf32>
    %4 = vector.broadcast %3 : vector<1x128xf32> to vector<64x128xf32>
    %5 = arith.addf %2, %4 : vector<64x128xf32>
    %cst_5 = arith.constant 0.000000e+00 : f32
    %6 = vector.broadcast %cst_5 : f32 to vector<64x128xf32>
    %7 = arith.maximumf %5, %6 : vector<64x128xf32>
    %8 = arith.truncf %7 : vector<64x128xf32> to vector<64x128xbf16>
    %c0_6 = arith.constant 0 : index
    %c0_7 = arith.constant 0 : index
    %9 = vector.load %arg4[%c0_6, %c0_7] : memref<128x128xbf16, #tpu.memory_space<vmem>>, vector<128x128xbf16>
    %cst_8 = arith.constant dense<0.000000e+00> : vector<64x128xf32>
    %10 = tpu.matmul %8, %9, %cst_8 {dimension_numbers = #tpu.dot_dimension_numbers<[1], [0], [0], [1], [0, 0, 1, 1], [], []>} : vector<64x128xbf16>, vector<128x128xbf16>, vector<64x128xf32> -> vector<64x128xf32>
    %c0_9 = arith.constant 0 : index
    %c0_10 = arith.constant 0 : index
    %11 = vector.load %arg5[%c0_9, %c0_10] : memref<1x128xf32, #tpu.memory_space<vmem>>, vector<1x128xf32>
    %12 = vector.broadcast %11 : vector<1x128xf32> to vector<64x128xf32>
    %13 = arith.addf %10, %12 : vector<64x128xf32>
    %14 = tpu.transpose %13, [1, 0] : vector<64x128xf32> -> vector<128x64xf32>
    %15 = arith.truncf %14 : vector<128x64xf32> to vector<128x64xbf16>
    %c0_11 = arith.constant 0 : index
    %c0_12 = arith.constant 0 : index
    %16 = vector.load %arg6[%c0_11, %c0_12] : memref<128x64xbf16, #tpu.memory_space<vmem>>, vector<128x64xbf16>
    tpu.vector_store %arg6[%c0_11, %c0_12], %15 {strides = array<i32>} : memref<128x64xbf16, #tpu.memory_space<vmem>>, vector<128x64xbf16>,
    return
  }
  func.func @transform_0(%arg0: i32) -> (i32, i32) {
    %c0_i32 = arith.constant 0 : i32
    %c0_i32_0 = arith.constant 0 : i32
    return %arg0, %c0_i32 : i32, i32
  }
  func.func @transform_1(%arg0: i32) -> (i32, i32) {
    %c0_i32 = arith.constant 0 : i32
    %c0_i32_0 = arith.constant 0 : i32
    %c0_i32_1 = arith.constant 0 : i32
    return %c0_i32, %c0_i32_0 : i32, i32
  }
  func.func @transform_2(%arg0: i32) -> (i32, i32) {
    %c0_i32 = arith.constant 0 : i32
    %c0_i32_0 = arith.constant 0 : i32
    %c0_i32_1 = arith.constant 0 : i32
    return %c0_i32, %c0_i32_0 : i32, i32
  }
  func.func @transform_3(%arg0: i32) -> (i32, i32) {
    %c0_i32 = arith.constant 0 : i32
    %c0_i32_0 = arith.constant 0 : i32
    %c0_i32_1 = arith.constant 0 : i32
    return %c0_i32, %c0_i32_0 : i32, i32
  }
  func.func @transform_4(%arg0: i32) -> (i32, i32) {
    %c0_i32 = arith.constant 0 : i32
    %c0_i32_0 = arith.constant 0 : i32
    %c0_i32_1 = arith.constant 0 : i32
    return %c0_i32, %c0_i32_0 : i32, i32
  }
  func.func @transform_5(%arg0: i32) -> (i32, i32) {
    %c0_i32 = arith.constant 0 : i32
    %c0_i32_0 = arith.constant 0 : i32
    return %c0_i32, %arg0 : i32, i32
  }
}

</mosaic_0001>

<bundles_post_ra>
// kernel: image_encoder_forward.1
= control target key start
LH: loop header
LB: loop body
LE: loop exit
PB: predicated region body
PF: predicated region fallthrough
CT: control target
= control target key end

     0   :  { %vm77_vm0 = vcmask 392192   ;;  %vm276_vm1 = vcmask 519168   ;;  %s547_s1 = inlined_call_operand.vmem [shape: bf16[48,128], index: 1, kind: input, shape index: {}]   ;;  %s548_s2 = inlined_call_operand.vmem [shape: f32[1,128], index: 2, kind: input, shape index: {}]   ;;  %s549_s0 = inlined_call_operand.vmem [shape: bf16[64,48], index: 0, kind: input, shape index: {}]   ;;  %s550_s3 = inlined_call_operand.vmem [shape: bf16[128,128], index: 3, kind: input, shape index: {}]   ;;  %s551_s4 = inlined_call_operand.vmem [shape: f32[1,128], index: 4, kind: input, shape index: {}]   ;;  %s552_s5 = inlined_call_operand.vmem [shape: bf16[128,64], index: 5, kind: output, shape index: {}]  }
   0x1   :  { %v367_v0 = vld [vmem:[%s547_s1 + $0x10] sm:$0xff]  ;;  %v366_v1 = vld [vmem:[%s547_s1 + $0x8] sm:$0xff]  ;;  %v365_v2 = vld [vmem:[%s547_s1] sm:$0xff] }
   0x2   :  { %95 = vmatpush.bf16.msra.mxu0 %v367_v0  ;;  %376 = vmatpush.bf16.msra.mxu3 %v367_v0  ;;  %v361_v3 = vld [vmem:[%s549_s0] sm:$0xff]  ;;  %v362_v4 = vld [vmem:[%s549_s0 + $0x8] sm:$0xff]  ;;  %v375_v5 = vld [vmem:[%s550_s3 + $0x38] sm:$0xff] }
   0x3   :  { %v374_v6 = vld [vmem:[%s550_s3 + $0x30] sm:$0xff]  ;;  %379 = vmatpush.bf16.msra.mxu1 %v375_v5  ;;  %380 = vmatpush.bf16.msra.mxu2 %v375_v5  ;;  %v373_v7 = vld [vmem:[%s550_s3 + $0x28] sm:$0xff]  ;;  %v372_v8 = vld [vmem:[%s550_s3 + $0x20] sm:$0xff] }
   0x4   :  { %v363_v9 = vld [vmem:[%s549_s0 + $0x10] sm:$0xff]  ;;  %v364_v10 = vld [vmem:[%s549_s0 + $0x18] sm:$0xff]  ;;  %v369_v13 = vld [vmem:[%s550_s3 + $0x8] sm:$0xff] }
   0x5   :  { %v371_v11 = vld [vmem:[%s550_s3 + $0x18] sm:$0xff]  ;;  %v370_v12 = vld [vmem:[%s550_s3 + $0x10] sm:$0xff]  ;;  %v368_v14 = vld [vmem:[%s550_s3] sm:$0xff] }
   0x6   :  { %96 = vmatpush.bf16.msra.mxu0 %v366_v1  ;;  %377 = vmatpush.bf16.msra.mxu3 %v366_v1  ;;  %v396_v16 = vld [vmem:[%s548_s2] ss:$0 sm:$0xff] }
   0x7   :  { %381 = vmatpush.bf16.msra.mxu1 %v374_v6  ;;  %382 = vmatpush.bf16.msra.mxu2 %v374_v6  ;;  %v397_v44 = vld [vmem:[%s551_s4] ss:$0 sm:$0xff] }
   0xa   :  { %97 = vmatpush.bf16.msra.mxu0 %v365_v2  ;;  %378 = vmatpush.bf16.msra.mxu3 %v365_v2 }
   0xb   :  { %383 = vmatpush.bf16.msra.mxu1 %v373_v7  ;;  %384 = vmatpush.bf16.msra.mxu2 %v373_v7 }
   0xd   :  { %325 = vmatmul.msk.bf16.vlgmr.msra.gmra.mxu0 %vm77_vm0, %v361_v3  ;;  %326 = vmatmul.msk.bf16.vlgmr.msra.gmra.mxu3 %vm77_vm0, %v362_v4 }
   0xe   :  { %199 = vmatpush.bf16.msrb.mxu0 %v375_v5 }
   0xf   :  { %385 = vmatpush.bf16.msra.mxu1 %v372_v8  ;;  %386 = vmatpush.bf16.msra.mxu2 %v372_v8 }
  0x12   :  { %200 = vmatpush.bf16.msrb.mxu0 %v374_v6 }
  0x13   :  { %387 = vmatpush.bf16.msra.mxu1 %v371_v11  ;;  %388 = vmatpush.bf16.msra.mxu2 %v371_v11 }
  0x16   :  { %201 = vmatpush.bf16.msrb.mxu0 %v373_v7 }
  0x17   :  { %389 = vmatpush.bf16.msra.mxu1 %v370_v12  ;;  %390 = vmatpush.bf16.msra.mxu2 %v370_v12 }
  0x1a   :  { %202 = vmatpush.bf16.msrb.mxu0 %v372_v8 }
  0x1b   :  { %391 = vmatpush.bf16.msra.mxu1 %v369_v13  ;;  %392 = vmatpush.bf16.msra.mxu2 %v369_v13 }
  0x1d   :  { %327 = vmatmul.msk.bf16.gmra.mxu3 %vm77_vm0, %v363_v9 }
  0x1e   :  { %203 = vmatpush.bf16.msrb.mxu0 %v371_v11 }
  0x1f   :  { %393 = vmatpush.bf16.msra.mxu1 %v368_v14  ;;  %394 = vmatpush.bf16.msra.mxu2 %v368_v14 }
  0x22   :  { %204 = vmatpush.bf16.msrb.mxu0 %v370_v12 }
  0x26   :  { %205 = vmatpush.bf16.msrb.mxu0 %v369_v13 }
  0x2a   :  { %206 = vmatpush.bf16.msrb.mxu0 %v368_v14 }
  0x2d   :  { %328 = vmatmul.msk.bf16.gmra.mxu3 %vm77_vm0, %v364_v10 }
  0x8a   :  { %v99_v15 = vpop.f32.mrf.mxu0 }
  0x8b   :  { %v100_v18 = vadd.f32 %v396_v16, %v99_v15 }
  0x8d   :  { %v119_v21 = vmax.f32 %v100_v18, 0.0 }
  0x90   :  { %v104_v17 = vpop.f32.mrf.mxu3 }
  0x91   :  { %v105_v23 = vadd.f32 %v396_v16, %v104_v17 }
  0x92   :  { %v101_v19 = vpop.f32.mrf.mxu0 }
  0x93   :  { %v102_v20 = vadd.f32 %v396_v16, %v101_v19  ;;  %v121_v27 = vmax.f32 %v105_v23, 0.0 }
  0x95   :  { %v120_v22 = vmax.f32 %v102_v20, 0.0 }
  0x97   :  { %v127_v24 = vpack.c.bf16 %v120_v22, %v119_v21 }
  0x98   :  { %v106_v25 = vpop.f32.mrf.mxu3 }
  0x99   :  { %v107_v26 = vadd.f32 %v396_v16, %v106_v25  ;;  %207 = vmatmul.bf16.vlgmr.msrb.gmra.mxu0 %v127_v24 }
  0x9b   :  { %v122_v28 = vmax.f32 %v107_v26, 0.0 }
  0x9d   :  { %v128_v29 = vpack.c.bf16 %v122_v28, %v121_v27 }
  0x9f   :  { %212 = vmatmul.bf16.vlgmr.msra.gmra.mxu1 %v128_v29 }
  0xa0   :  { %v109_v30 = vpop.f32.mrf.mxu3 }
  0xa1   :  { %v110_v31 = vadd.f32 %v396_v16, %v109_v30 }
  0xa3   :  { %v123_v34 = vmax.f32 %v110_v31, 0.0 }
  0xa8   :  { %v111_v32 = vpop.f32.mrf.mxu3 }
  0xa9   :  { %v112_v33 = vadd.f32 %v396_v16, %v111_v32 }
  0xab   :  { %v124_v35 = vmax.f32 %v112_v33, 0.0 }
  0xad   :  { %v129_v36 = vpack.c.bf16 %v124_v35, %v123_v34 }
  0xaf   :  { %217 = vmatmul.bf16.vlgmr.msra.gmra.mxu2 %v129_v36 }
  0xb0   :  { %v114_v37 = vpop.f32.mrf.mxu3 }
  0xb1   :  { %v115_v38 = vadd.f32 %v396_v16, %v114_v37 }
  0xb3   :  { %v125_v41 = vmax.f32 %v115_v38, 0.0 }
  0xb8   :  { %v116_v39 = vpop.f32.mrf.mxu3 }
  0xb9   :  { %v117_v40 = vadd.f32 %v396_v16, %v116_v39 }
  0xbb   :  { %v126_v42 = vmax.f32 %v117_v40, 0.0 }
  0xbd   :  { %v130_v43 = vpack.c.bf16 %v126_v42, %v125_v41 }
  0xbf   :  { %222 = vmatmul.bf16.gmra.mxu2 %v130_v43 }
 0x116   :  { %v208_v45 = vpop.f32.mrf.mxu0 }
 0x117   :  { %v209_v46 = vadd.f32 %v397_v44, %v208_v45 }
 0x119   :  { %228 = vxpose.xlu0.b32.start [1/8] (short) %v209_v46, 128 }
 0x11c   :  { %v213_v49 = vpop.f32.mrf.mxu1 }
 0x11d   :  { %v214_v50 = vadd.f32 %v397_v44, %v213_v49 }
 0x11e   :  { %v210_v47 = vpop.f32.mrf.mxu0 }
 0x11f   :  { %v211_v48 = vadd.f32 %v397_v44, %v210_v47 }
 0x121   :  { %229 = vxpose.xlu0.b32.cont [2/8] (short) %v211_v48, 128 }
 0x124   :  { %v215_v51 = vpop.f32.mrf.mxu1 }
 0x125   :  { %v216_v52 = vadd.f32 %v397_v44, %v215_v51 }
 0x129   :  { %230 = vxpose.xlu0.b32.cont [3/8] (short) %v214_v50, 128 }
 0x131   :  { %231 = vxpose.xlu0.b32.cont [4/8] (short) %v216_v52, 128 }
 0x132   :  { %v218_v53 = vpop.f32.mrf.mxu2 }
 0x133   :  { %v219_v54 = vadd.f32 %v397_v44, %v218_v53 }
 0x139   :  { %232 = vxpose.xlu0.b32.cont [5/8] (short) %v219_v54, 128 }
 0x13a   :  { %v220_v55 = vpop.f32.mrf.mxu2 }
 0x13b   :  { %v221_v56 = vadd.f32 %v397_v44, %v220_v55 }
 0x141   :  { %233 = vxpose.xlu0.b32.cont [6/8] (short) %v221_v56, 128 }
 0x142   :  { %v223_v57 = vpop.f32.mrf.mxu2 }
 0x143   :  { %v224_v58 = vadd.f32 %v397_v44, %v223_v57 }
 0x149   :  { %234 = vxpose.xlu0.b32.cont [7/8] (short) %v224_v58, 128 }
 0x14a   :  { %v225_v59 = vpop.f32.mrf.mxu2 }
 0x14b   :  { %v226_v60 = vadd.f32 %v397_v44, %v225_v59 }
 0x151   :  { %235 = vxpose.xlu0.b32.end [8/8] (short) %v226_v60, 128 }
 0x1bd   :  { %v244_v61 = vpop.trf.xlu0 }
 0x1be   :  { %v260_v62 = vpack.c.bf16 %v244_v61, %v244_v61 }
 0x1c0   :  { %277 = vst.msk [vmem:[%s552_s5] sm:$0xf] %vm276_vm1, %v260_v62 }
 0x1c5   :  { %v245_v63 = vpop.trf.xlu0 }
 0x1c6   :  { %v261_v0 = vpack.c.bf16 %v245_v63, %v245_v63 }
 0x1c8   :  { %278 = vst.msk [vmem:[%s552_s5 + $0x4] sm:$0xf] %vm276_vm1, %v261_v0 }
 0x1cd   :  { %v246_v1 = vpop.trf.xlu0 }
 0x1ce   :  { %v262_v2 = vpack.c.bf16 %v246_v1, %v246_v1 }
 0x1d0   :  { %279 = vst.msk [vmem:[%s552_s5 + $0x8] sm:$0xf] %vm276_vm1, %v262_v2 }
 0x1d5   :  { %v247_v3 = vpop.trf.xlu0 }
 0x1d6   :  { %v263_v4 = vpack.c.bf16 %v247_v3, %v247_v3 }
 0x1d8   :  { %280 = vst.msk [vmem:[%s552_s5 + $0xc] sm:$0xf] %vm276_vm1, %v263_v4 }
 0x1dd   :  { %v248_v5 = vpop.trf.xlu0 }
 0x1de   :  { %v264_v6 = vpack.c.bf16 %v248_v5, %v248_v5 }
 0x1e0   :  { %281 = vst.msk [vmem:[%s552_s5 + $0x10] sm:$0xf] %vm276_vm1, %v264_v6 }
 0x1e5   :  { %v249_v7 = vpop.trf.xlu0 }
 0x1e6   :  { %v265_v8 = vpack.c.bf16 %v249_v7, %v249_v7 }
 0x1e8   :  { %282 = vst.msk [vmem:[%s552_s5 + $0x14] sm:$0xf] %vm276_vm1, %v265_v8 }
 0x1ed   :  { %v250_v9 = vpop.trf.xlu0 }
 0x1ee   :  { %v266_v10 = vpack.c.bf16 %v250_v9, %v250_v9 }
 0x1f0   :  { %283 = vst.msk [vmem:[%s552_s5 + $0x18] sm:$0xf] %vm276_vm1, %v266_v10 }
 0x1f5   :  { %v251_v11 = vpop.trf.xlu0 }
 0x1f6   :  { %v267_v12 = vpack.c.bf16 %v251_v11, %v251_v11 }
 0x1f8   :  { %284 = vst.msk [vmem:[%s552_s5 + $0x1c] sm:$0xf] %vm276_vm1, %v267_v12 }
 0x1fd   :  { %v252_v13 = vpop.trf.xlu0 }
 0x1fe   :  { %v268_v14 = vpack.c.bf16 %v252_v13, %v252_v13 }
 0x200   :  { %285 = vst.msk [vmem:[%s552_s5 + $0x20] sm:$0xf] %vm276_vm1, %v268_v14 }
 0x205   :  { %v253_v15 = vpop.trf.xlu0 }
 0x206   :  { %v269_v16 = vpack.c.bf16 %v253_v15, %v253_v15 }
 0x208   :  { %286 = vst.msk [vmem:[%s552_s5 + $0x24] sm:$0xf] %vm276_vm1, %v269_v16 }
 0x20d   :  { %v254_v17 = vpop.trf.xlu0 }
 0x20e   :  { %v270_v18 = vpack.c.bf16 %v254_v17, %v254_v17 }
 0x210   :  { %287 = vst.msk [vmem:[%s552_s5 + $0x28] sm:$0xf] %vm276_vm1, %v270_v18 }
 0x215   :  { %v255_v19 = vpop.trf.xlu0 }
 0x216   :  { %v271_v20 = vpack.c.bf16 %v255_v19, %v255_v19 }
 0x218   :  { %288 = vst.msk [vmem:[%s552_s5 + $0x2c] sm:$0xf] %vm276_vm1, %v271_v20 }
 0x21d   :  { %v256_v21 = vpop.trf.xlu0 }
 0x21e   :  { %v272_v22 = vpack.c.bf16 %v256_v21, %v256_v21 }
 0x220   :  { %289 = vst.msk [vmem:[%s552_s5 + $0x30] sm:$0xf] %vm276_vm1, %v272_v22 }
 0x225   :  { %v257_v23 = vpop.trf.xlu0 }
 0x226   :  { %v273_v24 = vpack.c.bf16 %v257_v23, %v257_v23 }
 0x228   :  { %290 = vst.msk [vmem:[%s552_s5 + $0x34] sm:$0xf] %vm276_vm1, %v273_v24 }
 0x22d   :  { %v258_v25 = vpop.trf.xlu0 }
 0x22e   :  { %v274_v26 = vpack.c.bf16 %v258_v25, %v258_v25 }
 0x230   :  { %291 = vst.msk [vmem:[%s552_s5 + $0x38] sm:$0xf] %vm276_vm1, %v274_v26 }
 0x235   :  { %v259_v27 = vpop.trf.xlu0 }
 0x236   :  { %v275_v28 = vpack.c.bf16 %v259_v27, %v259_v27 }
 0x238   :  { %292 = vst.msk [vmem:[%s552_s5 + $0x3c] sm:$0xf] %vm276_vm1, %v275_v28 }

</bundles_post_ra>
